<compile_context>
chip_gen: v7x
topology: tpu7x:2x2x1
jax: 0.10.0
libtpu: 0.0.40
codegen_flags: <defaults>
</compile_context>

<pallas_src>
import functools
import math

import jax
import jax.numpy as jnp
from jax import lax
from jax.experimental import pallas as pl
from jax.experimental.pallas import tpu as pltpu

_LANE = 128
_WIDTH = 512            # lane-dense slab width (multiple of 128)
_MAX_BLOCK_ROWS = 512   # rows per grid step for large inputs


def _mix(x):
    """lowbias32 integer hash (uint32 -> uint32); pure VPU integer ops."""
    x = x ^ (x >> 16)
    x = x * jnp.uint32(0x7FEB352D)
    x = x ^ (x >> 15)
    x = x * jnp.uint32(0x846CA68B)
    x = x ^ (x >> 16)
    return x


def _uniform01(bits):
    """uint32 random bits -> float32 uniform in [0, 1) (mantissa/exponent trick)."""
    fbits = jnp.bitwise_or(jnp.bitwise_and(bits, jnp.uint32(0x007FFFFF)),
                           jnp.uint32(0x3F800000))
    return lax.bitcast_convert_type(fbits, jnp.float32) - jnp.float32(1.0)


def _noise_kernel(seed_ref, x_ref, o_ref, *, block_rows, mean, std,
                  clip_min, clip_max):
    rows, width = x_ref.shape
    half = width // 2

    # ---- stateless counter-based PRNG (unique counter per element) ----
    row = lax.broadcasted_iota(jnp.int32, (rows, half), 0)
    col = lax.broadcasted_iota(jnp.int32, (rows, half), 1)
    g_row = pl.program_id(0) * block_rows + row
    counter = (g_row * half + col).astype(jnp.uint32)
    key = seed_ref[0].astype(jnp.uint32)

    b1 = _mix(counter ^ key)
    b2 = _mix(counter ^ key ^ jnp.uint32(0x9E3779B9))

    # ---- Box-Muller using BOTH outputs: halves transcendental work ----
    u1 = jnp.float32(1.0) - _uniform01(b1)          # (0, 1], log-safe
    u2 = _uniform01(b2)                              # [0, 1)
    r = jnp.sqrt(jnp.float32(-2.0) * jnp.log(u1))
    theta = jnp.float32(2.0 * math.pi) * u2
    z = jnp.concatenate([r * jnp.cos(theta), r * jnp.sin(theta)], axis=-1)

    y = x_ref[...].astype(jnp.float32) + jnp.float32(std) * z + jnp.float32(mean)
    y = jnp.maximum(jnp.minimum(y, jnp.float32(clip_max)), jnp.float32(clip_min))
    o_ref[...] = y.astype(o_ref.dtype)


def apply_noise(x, seed, mean, std, clip_min=0.0, clip_max=1.0):
    """Pallas equivalent of ApplyNoise.forward.

    Noise stream is a counter-based hash PRNG (not torch's RNG), which is
    acceptable for augmentation noise and deterministic given `seed`.
    """
    orig_shape = x.shape
    orig_dtype = x.dtype

    n = math.prod(orig_shape)
    width = _WIDTH if n >= _WIDTH else _LANE
    rows = pl.cdiv(n, width)
    n_pad = rows * width

    flat = x.reshape(-1)
    if n_pad != n:
        flat = jnp.pad(flat, (0, n_pad - n))
    x2 = flat.reshape(rows, width)

    # Single grid step (full-extent block) for anything up to ~2 MiB of f32;
    # otherwise tile rows in 512-row blocks (partial last block handled by Pallas).
    block_rows = rows if rows <= 2 * _MAX_BLOCK_ROWS else _MAX_BLOCK_ROWS
    grid = (pl.cdiv(rows, block_rows),)

    seed_arr = jnp.asarray([seed], jnp.int32)
    kernel = functools.partial(
        _noise_kernel,
        block_rows=block_rows,
        mean=float(mean),
        std=float(std),
        clip_min=float(clip_min),
        clip_max=float(clip_max),
    )

    out2 = pl.pallas_call(
        kernel,
        out_shape=jax.ShapeDtypeStruct((rows, width), orig_dtype),
        grid_spec=pltpu.PrefetchScalarGridSpec(
            num_scalar_prefetch=1,
            grid=grid,
            in_specs=[pl.BlockSpec((block_rows, width), lambda i, seed: (i, 0))],
            out_specs=pl.BlockSpec((block_rows, width), lambda i, seed: (i, 0)),
        ),
        compiler_params=pltpu.CompilerParams(
            dimension_semantics=("parallel",)),  # stateless PRNG -> safe to shard
    )(seed_arr, x2)

    out = out2.reshape(-1)
    if n_pad != n:
        out = out[:n]
    return out.reshape(orig_shape)


if __name__ == "__main__":
    key = jax.random.PRNGKey(0)
    # Small image batch, NCHW like the PyTorch dataset transform would see.
    x = jax.random.uniform(key, (2, 4, 16, 16), dtype=jnp.float32)

    mean, std = 0.1, 0.05
    clip_min, clip_max = 0.0, 1.0

    y = apply_noise(x, seed=1234, mean=mean, std=std,
                    clip_min=clip_min, clip_max=clip_max)
    y = jax.block_until_ready(y)

    assert y.shape == x.shape and y.dtype == x.dtype
    assert bool(jnp.all(jnp.isfinite(y)))
    assert bool(jnp.all(y >= clip_min)) and bool(jnp.all(y <= clip_max))
    # Noise actually changed something.
    assert bool(jnp.any(jnp.abs(y - x) > 0))

    print("KERNEL_OK")
</pallas_src>

<mosaic_0001>
module attributes {stable_mosaic.version = 11 : i64} {
  func.func @_noise_kernel(%arg0: i32, %arg1: memref<1xi32, #tpu.memory_space<smem>>, %arg2: memref<4x512xf32, #tpu.memory_space<vmem>>, %arg3: memref<4x512xf32, #tpu.memory_space<vmem>>) attributes {dimension_semantics = [#tpu.dimension_semantics<parallel>], iteration_bounds = array<i64: 1>, scalar_prefetch = 1 : i64, scratch_operands = 0 : i64, tpu.core_type = #tpu.core_type<tc>, window_params = [{transform_indices = @transform_0, window_bounds = array<i64: 4, 512>}, {transform_indices = @transform_1, window_bounds = array<i64: 4, 512>}]} {
    %0 = tpu.iota {dimensions = array<i32: 0>} : vector<4x256xi32>
    %1 = tpu.iota {dimensions = array<i32: 1>} : vector<4x256xi32>
    %c4_i32 = arith.constant 4 : i32
    %2 = arith.muli %arg0, %c4_i32 : i32
    %3 = vector.broadcast %2 : i32 to vector<4x256xi32>
    %4 = arith.addi %3, %0 : vector<4x256xi32>
    %c256_i32 = arith.constant 256 : i32
    %5 = vector.broadcast %c256_i32 : i32 to vector<4x256xi32>
    %6 = arith.muli %4, %5 : vector<4x256xi32>
    %7 = arith.addi %6, %1 : vector<4x256xi32>
    %c0 = arith.constant 0 : index
    %8 = memref.load %arg1[%c0] : memref<1xi32, #tpu.memory_space<smem>>
    %9 = vector.broadcast %8 : i32 to vector<4x256xi32>
    %10 = arith.xori %7, %9 : vector<4x256xi32>
    %c16_i32 = arith.constant 16 : i32
    %11 = vector.broadcast %c16_i32 : i32 to vector<4x256xi32>
    %12 = arith.shrui %10, %11 : vector<4x256xi32>
    %13 = arith.xori %10, %12 : vector<4x256xi32>
    %c2146121005_i32 = arith.constant 2146121005 : i32
    %14 = vector.broadcast %c2146121005_i32 : i32 to vector<4x256xi32>
    %15 = arith.muli %13, %14 : vector<4x256xi32>
    %c15_i32 = arith.constant 15 : i32
    %16 = vector.broadcast %c15_i32 : i32 to vector<4x256xi32>
    %17 = arith.shrui %15, %16 : vector<4x256xi32>
    %18 = arith.xori %15, %17 : vector<4x256xi32>
    %c-2073254261_i32 = arith.constant -2073254261 : i32
    %19 = vector.broadcast %c-2073254261_i32 : i32 to vector<4x256xi32>
    %20 = arith.muli %18, %19 : vector<4x256xi32>
    %c16_i32_0 = arith.constant 16 : i32
    %21 = vector.broadcast %c16_i32_0 : i32 to vector<4x256xi32>
    %22 = arith.shrui %20, %21 : vector<4x256xi32>
    %23 = arith.xori %20, %22 : vector<4x256xi32>
    %24 = vector.broadcast %8 : i32 to vector<4x256xi32>
    %25 = arith.xori %7, %24 : vector<4x256xi32>
    %c-1640531527_i32 = arith.constant -1640531527 : i32
    %26 = vector.broadcast %c-1640531527_i32 : i32 to vector<4x256xi32>
    %27 = arith.xori %25, %26 : vector<4x256xi32>
    %c16_i32_1 = arith.constant 16 : i32
    %28 = vector.broadcast %c16_i32_1 : i32 to vector<4x256xi32>
    %29 = arith.shrui %27, %28 : vector<4x256xi32>
    %30 = arith.xori %27, %29 : vector<4x256xi32>
    %c2146121005_i32_2 = arith.constant 2146121005 : i32
    %31 = vector.broadcast %c2146121005_i32_2 : i32 to vector<4x256xi32>
    %32 = arith.muli %30, %31 : vector<4x256xi32>
    %c15_i32_3 = arith.constant 15 : i32
    %33 = vector.broadcast %c15_i32_3 : i32 to vector<4x256xi32>
    %34 = arith.shrui %32, %33 : vector<4x256xi32>
    %35 = arith.xori %32, %34 : vector<4x256xi32>
    %c-2073254261_i32_4 = arith.constant -2073254261 : i32
    %36 = vector.broadcast %c-2073254261_i32_4 : i32 to vector<4x256xi32>
    %37 = arith.muli %35, %36 : vector<4x256xi32>
    %c16_i32_5 = arith.constant 16 : i32
    %38 = vector.broadcast %c16_i32_5 : i32 to vector<4x256xi32>
    %39 = arith.shrui %37, %38 : vector<4x256xi32>
    %40 = arith.xori %37, %39 : vector<4x256xi32>
    %c8388607_i32 = arith.constant 8388607 : i32
    %41 = vector.broadcast %c8388607_i32 : i32 to vector<4x256xi32>
    %42 = arith.andi %23, %41 : vector<4x256xi32>
    %c1065353216_i32 = arith.constant 1065353216 : i32
    %43 = vector.broadcast %c1065353216_i32 : i32 to vector<4x256xi32>
    %44 = arith.ori %42, %43 : vector<4x256xi32>
    %45 = tpu.bitcast %44 : vector<4x256xi32> -> vector<4x256xf32>
    %cst = arith.constant 1.000000e+00 : f32
    %46 = vector.broadcast %cst : f32 to vector<4x256xf32>
    %47 = arith.subf %45, %46 : vector<4x256xf32>
    %cst_6 = arith.constant 1.000000e+00 : f32
    %48 = vector.broadcast %cst_6 : f32 to vector<4x256xf32>
    %49 = arith.subf %48, %47 : vector<4x256xf32>
    %c8388607_i32_7 = arith.constant 8388607 : i32
    %50 = vector.broadcast %c8388607_i32_7 : i32 to vector<4x256xi32>
    %51 = arith.andi %40, %50 : vector<4x256xi32>
    %c1065353216_i32_8 = arith.constant 1065353216 : i32
    %52 = vector.broadcast %c1065353216_i32_8 : i32 to vector<4x256xi32>
    %53 = arith.ori %51, %52 : vector<4x256xi32>
    %54 = tpu.bitcast %53 : vector<4x256xi32> -> vector<4x256xf32>
    %cst_9 = arith.constant 1.000000e+00 : f32
    %55 = vector.broadcast %cst_9 : f32 to vector<4x256xf32>
    %56 = arith.subf %54, %55 : vector<4x256xf32>
    %57 = math.log %49 : vector<4x256xf32>
    %cst_10 = arith.constant -2.000000e+00 : f32
    %58 = vector.broadcast %cst_10 : f32 to vector<4x256xf32>
    %59 = arith.mulf %58, %57 : vector<4x256xf32>
    %60 = math.sqrt %59 : vector<4x256xf32>
    %cst_11 = arith.constant 6.28318548 : f32
    %61 = vector.broadcast %cst_11 : f32 to vector<4x256xf32>
    %62 = arith.mulf %61, %56 : vector<4x256xf32>
    %63 = math.cos %62 : vector<4x256xf32>
    %64 = arith.mulf %60, %63 : vector<4x256xf32>
    %65 = math.sin %62 : vector<4x256xf32>
    %66 = arith.mulf %60, %65 : vector<4x256xf32>
    %67 = tpu.concatenate %64, %66 in 1 : vector<4x256xf32>, vector<4x256xf32> -> vector<4x512xf32>
    %c0_12 = arith.constant 0 : index
    %c0_13 = arith.constant 0 : index
    %68 = vector.load %arg2[%c0_12, %c0_13] : memref<4x512xf32, #tpu.memory_space<vmem>>, vector<4x512xf32>
    %cst_14 = arith.constant 5.000000e-02 : f32
    %69 = vector.broadcast %cst_14 : f32 to vector<4x512xf32>
    %70 = arith.mulf %69, %67 : vector<4x512xf32>
    %71 = arith.addf %68, %70 : vector<4x512xf32>
    %cst_15 = arith.constant 1.000000e-01 : f32
    %72 = vector.broadcast %cst_15 : f32 to vector<4x512xf32>
    %73 = arith.addf %71, %72 : vector<4x512xf32>
    %cst_16 = arith.constant 1.000000e+00 : f32
    %74 = vector.broadcast %cst_16 : f32 to vector<4x512xf32>
    %75 = arith.minimumf %73, %74 : vector<4x512xf32>
    %cst_17 = arith.constant 0.000000e+00 : f32
    %76 = vector.broadcast %cst_17 : f32 to vector<4x512xf32>
    %77 = arith.maximumf %75, %76 : vector<4x512xf32>
    %c0_18 = arith.constant 0 : index
    %c0_19 = arith.constant 0 : index
    %78 = vector.load %arg3[%c0_18, %c0_19] : memref<4x512xf32, #tpu.memory_space<vmem>>, vector<4x512xf32>
    tpu.vector_store %arg3[%c0_18, %c0_19], %77 {strides = array<i32>} : memref<4x512xf32, #tpu.memory_space<vmem>>, vector<4x512xf32>,
    return
  }
  func.func @transform_0(%arg0: i32, %arg1: memref<1xi32, #tpu.memory_space<smem>>) -> (i32, i32) {
    %c0_i32 = arith.constant 0 : i32
    %c0_i32_0 = arith.constant 0 : i32
    return %arg0, %c0_i32 : i32, i32
  }
  func.func @transform_1(%arg0: i32, %arg1: memref<1xi32, #tpu.memory_space<smem>>) -> (i32, i32) {
    %c0_i32 = arith.constant 0 : i32
    %c0_i32_0 = arith.constant 0 : i32
    return %arg0, %c0_i32 : i32, i32
  }
}

</mosaic_0001>

<bundles_post_ra>
// kernel: tpu_custom_call.1
= control target key start
LH: loop header
LB: loop body
LE: loop exit
PB: predicated region body
PF: predicated region fallthrough
CT: control target
= control target key end

     0   :  { %8 = vsyncpa [#allocation5], 0  ;;  %s813_s0 = inlined_call_operand.<no memory space> [shape: s32[1], index: 0, kind: input, shape index: {}]   ;;  %s814_s1 = inlined_call_operand.hbm [shape: f32[4,512], index: 1, kind: input, shape index: {}]   ;;  %s815_s2 = inlined_call_operand.hbm [shape: f32[4,512], index: 2, kind: output, shape index: {}]  }
   0x1   :  { %9 = vsyncpa [#allocation6], 0  ;;  %s669_s9 = smov [#allocation4]   ;;  %s621_s13 = scalar_lea.hbm %s814_s1, 256 }
   0x2   :  { %s16_s10 = sshll.u32 %s669_s9, 4  ;;  %p622_p0 = scmp.ne.s32.totalorder %s814_s1, %s621_s13  ;;  %s17_s10 = int_to_ptr.vmem [resolvable:$true] %s16_s10 }
   0x3   :  { %p625_p1 = scmp.lt.u32.totalorder %s621_s13, %s814_s1 }
   0x5   :  { %p627_p2 = pnand %p625_p1, %p622_p0 }
   0x7   :  { %630 = shalt.err (!%p627_p2)
}
   0x8   :  { %s631_s18 = scalar_lea.vmem %s17_s10, 256  ;;  %p636_p4 = scmp.lt.s32.totalorder %s17_s10, %s17_s10 }
   0x9   :  { %p632_p3 = scmp.ne.s32.totalorder %s17_s10, %s631_s18  ;;  %p637_p5 = scmp.lt.s32.totalorder %s631_s18, %s631_s18 }
   0xb   :  { %p638_p6 = por %p637_p5, %p636_p4 }
   0xd   :  { %p639_p7 = pnand %p638_p6, %p632_p3 }
   0xf   :  { %642 = shalt.err (!%p639_p7)
}
  0x10   :  { %19 = dma.hbm_to_vmem [thread:$0]  %s814_s1, 256, %s17_s10, [#allocation5]  }
  0x11   :  { %665 = dma.done.wait [#allocation5], 256  }
  0x12   :  { %666 = vsyncadd [#allocation5], 4294967040  ;;  %v23_v0 = vlaneseq  ;;  %v35_v5 = vstv %s813_s0  ;;  %v670_v63 = vmov 683565275   ;;  %s676_s0 = smov [#allocation7]  }
  0x13   :  { %s560_s1 = sshll.u32 %s676_s0, 4  ;;  %s561_s1 = int_to_ptr.vmem [resolvable:$true] %s560_s1 }
  0x14   :  { %v24_v1 = vshrl.u32 %v23_v0, 7  ;;  %v26_v2 = vand.u32 127, %v23_v0  ;;  %s643_s23 = scalar_lea.vmem %s561_s1, 256  ;;  %p648_p9 = scmp.lt.s32.totalorder %s561_s1, %s561_s1 }
  0x15   :  { %p644_p8 = scmp.ne.s32.totalorder %s561_s1, %s643_s23  ;;  %p649_p10 = scmp.lt.s32.totalorder %s643_s23, %s643_s23 }
  0x16   :  { %v27_v3 = vadd.s32 128, %v26_v2  ;;  %v31_v4 = vmul.u32 256, %v24_v1  ;;  %v671_v1 = vmov 2475754826  }
  0x17   :  { %p650_p11 = por %p649_p10, %p648_p9 }
  0x18   :  { %v32_v6 = vadd.s32 %v31_v4, %v26_v2  ;;  %v33_v7 = vadd.s32 %v31_v4, %v27_v3 }
  0x19   :  { %p651_p12 = pnand %p650_p11, %p644_p8 }
  0x1a   :  { %v36_v8 = vxor.u32 %v35_v5, %v32_v6  ;;  %v37_v9 = vxor.u32 %v35_v5, %v33_v7 }
  0x1c   :  { %v54_v10 = vxor.u32 2654435769, %v36_v8  ;;  %v55_v11 = vxor.u32 2654435769, %v37_v9  ;;  %v38_v26 = vshrl.u32 %v36_v8, 16  ;;  %v39_v36 = vshrl.u32 %v37_v9, 16 }
  0x1e   :  { %v56_v12 = vshrl.u32 %v54_v10, 16  ;;  %v57_v13 = vshrl.u32 %v55_v11, 16  ;;  %v40_v31 = vxor.u32 %v38_v26, %v36_v8  ;;  %v41_v41 = vxor.u32 %v39_v36, %v37_v9 }
  0x1f   :  { %v672_v9 = vmov 2131351028  }
  0x20   :  { %v58_v14 = vxor.u32 %v56_v12, %v54_v10  ;;  %v59_v15 = vxor.u32 %v57_v13, %v55_v11  ;;  %v42_v37 = vmul.u32 2146121005, %v40_v31  ;;  %v43_v48 = vmul.u32 2146121005, %v41_v41 }
  0x21   :  { %v673_v12 = vmov 2102212464  }
  0x22   :  { %v60_v16 = vmul.u32 2146121005, %v58_v14  ;;  %v61_v17 = vmul.u32 2146121005, %v59_v15  ;;  %v44_v43 = vshrl.u32 %v42_v37, 15  ;;  %v45_v54 = vshrl.u32 %v43_v48, 15 }
  0x23   :  { %v674_v15 = vmov 920167782  }
  0x24   :  { %v62_v18 = vshrl.u32 %v60_v16, 15  ;;  %v63_v19 = vshrl.u32 %v61_v17, 15  ;;  %v46_v50 = vxor.u32 %v44_v43, %v42_v37  ;;  %v716_v61 = vxor.u32 %v45_v54, %v43_v48 }
  0x26   :  { %v64_v20 = vxor.u32 %v62_v18, %v60_v16  ;;  %v65_v21 = vxor.u32 %v63_v19, %v61_v17  ;;  %v48_v56 = vmul.u32 2221713035, %v46_v50  ;;  %v49_v31 = vmul.u32 2221713035, %v716_v61 }
  0x28   :  { %v66_v22 = vmul.u32 2221713035, %v64_v20  ;;  %v67_v23 = vmul.u32 2221713035, %v65_v21  ;;  %v50_v3 = vshrl.u32 %v48_v56, 16  ;;  %v51_v50 = vshrl.u32 %v49_v31, 16 }
  0x29   :  { %v675_v20 = vmov 1326507024  }
  0x2a   :  { %v68_v24 = vshrl.u32 %v66_v22, 16  ;;  %v69_v25 = vshrl.u32 %v67_v23, 16 }
  0x2c   :  { %v70_v27 = vxor.u32 %v68_v24, %v66_v22  ;;  %v71_v28 = vxor.u32 %v69_v25, %v67_v23 }
  0x2e   :  { %v82_v29 = vand.u32 8388607, %v70_v27  ;;  %v83_v30 = vand.u32 8388607, %v71_v28 }
  0x30   :  { %v84_v32 = vor.u32 1065353216, %v82_v29  ;;  %v85_v33 = vor.u32 1065353216, %v83_v30 }
  0x32   :  { %v571_v34 = vadd.f32 -1.0, %v84_v32  ;;  %v572_v35 = vadd.f32 -1.0, %v85_v33 }
  0x34   :  { %v707_v38 = vmul.f32 6.2831855, %v571_v34  ;;  %v709_v39 = vmul.f32 6.2831855, %v572_v35  ;;  %v52_v35 = vxor.u32 %v50_v3, %v48_v56 }
  0x36   :  { %v115_v40 = vand.u32 2139095040, %v707_v38  ;;  %v218_v42 = vand.u32 2139095040, %v709_v39  ;;  %v112_v44 = vand.u32 2147483647, %v707_v38  ;;  %v215_v5 = vand.u32 2147483647, %v709_v39 }
  0x37   :  { %vm114_vm13 = vcmp.lt.s32.totalorder %v707_v38, 0 }
  0x38   :  { %v116_v45 = vshrl.u32 %v115_v40, 23  ;;  %v219_v46 = vshrl.u32 %v218_v42, 23  ;;  %v119_v51 = vand.u32 8388607, %v112_v44  ;;  %v222_v40 = vand.u32 8388607, %v215_v5 }
  0x39   :  { %vm769_vm14 = vcmp.le.f32.partialorder %v112_v44, 0.7853982 }
  0x3a   :  { %v573_v47 = vadd.s32 4294967169, %v116_v45  ;;  %v577_v49 = vadd.s32 4294967169, %v219_v46  ;;  %v120_v57 = vor.u32 8388608, %v119_v51 }
  0x3c   :  { %v122_v52 = vadd.s32 1, %v573_v47  ;;  %v225_v53 = vadd.s32 1, %v577_v49  ;;  %v718_v4 = vshll.u32 %v120_v57, 8 }
  0x3e   :  { %vm123_vm0 = vcmp.gt.s32.totalorder %v122_v52, 0  ;;  %vm226_vm1 = vcmp.gt.s32.totalorder %v225_v53, 0 }
  0x3f   :  { %v124_v55 = vsel %vm123_vm0, %v122_v52, 0  ;;  %v227_v59 = vsel %vm226_vm1, %v225_v53, 0  ;;  %vm217_vm0 = vcmp.lt.s32.totalorder %v709_v39, 0  ;;  %vm216_vm1 = vcmp.le.f32.partialorder %v215_v5, 0.7853982 }
  0x40   :  { %v126_v58 = vand.u32 31, %v124_v55  ;;  %v125_v62 = vshrl.u32 %v124_v55, 5  ;;  %v721_v6 = vand.u32 31, %v227_v59  ;;  %v223_v55 = vor.u32 8388608, %v222_v40 }
  0x41   :  { %v228_v56 = vshrl.u32 %v227_v59, 5 }
  0x42   :  { %v127_v60 = vsub.s32 32, %v126_v58  ;;  %v129_v0 = vshll.u32 %v670_v63, %v126_v58  ;;  %v132_v2 = vshll.u32 %v671_v1, %v126_v58  ;;  %v135_v11 = vshll.u32 %v672_v9, %v126_v58 }
  0x43   :  { %v138_v14 = vshll.u32 %v673_v12, %v126_v58  ;;  %v141_v17 = vshll.u32 %v674_v15, %v126_v58  ;;  %vm144_vm2 = vcmp.lt.s32.totalorder %v125_v62, 1  ;;  %vm145_vm3 = vcmp.lt.s32.totalorder %v125_v62, 2 }
  0x44   :  { %v128_v7 = vshrl.u32 %v670_v63, %v127_v60  ;;  %v130_v8 = vshrl.u32 %v671_v1, %v127_v60  ;;  %v133_v10 = vshrl.u32 %v672_v9, %v127_v60  ;;  %v136_v13 = vshrl.u32 %v673_v12, %v127_v60 }
  0x45   :  { %v139_v16 = vshrl.u32 %v674_v15, %v127_v60  ;;  %v142_v21 = vshrl.u32 %v675_v20, %v127_v60  ;;  %vm146_vm4 = vcmp.lt.s32.totalorder %v125_v62, 3  ;;  %vm147_vm5 = vcmp.lt.s32.totalorder %v125_v62, 4 }
  0x46   :  { %v131_v18 = vor.u32 %v130_v8, %v129_v0  ;;  %v134_v19 = vor.u32 %v133_v10, %v132_v2  ;;  %v137_v22 = vor.u32 %v136_v13, %v135_v11  ;;  %v230_v30 = vsub.s32 32, %v721_v6 }
  0x47   :  { %v140_v23 = vor.u32 %v139_v16, %v138_v14  ;;  %v143_v24 = vor.u32 %v142_v21, %v141_v17  ;;  %v232_v48 = vshll.u32 %v670_v63, %v721_v6  ;;  %v235_v51 = vshll.u32 %v671_v1, %v721_v6 }
  0x48   :  { %v148_v25 = vsel %vm144_vm2, %v128_v7, %v131_v18  ;;  %v152_v26 = vsel %vm144_vm2, %v131_v18, %v134_v19  ;;  %v149_v27 = vsel %vm147_vm5, %v137_v22, 2102212464  ;;  %v156_v29 = vsel %vm144_vm2, %v134_v19, %v137_v22 }
  0x49   :  { %v153_v28 = vsel %vm147_vm5, %v140_v23, 920167782  ;;  %v150_v32 = vsel %vm146_vm4, %v134_v19, %v149_v27  ;;  %v157_v34 = vsel %vm147_vm5, %v143_v24, 1326507024  ;;  %v233_v49 = vshrl.u32 %v671_v1, %v230_v30 }
  0x4a   :  { %v154_v33 = vsel %vm146_vm4, %v137_v22, %v153_v28  ;;  %v158_v37 = vsel %vm146_vm4, %v140_v23, %v157_v34  ;;  %v151_v41 = vsel %vm145_vm3, %v148_v25, %v150_v32  ;;  %v236_v52 = vshrl.u32 %v672_v9, %v230_v30 }
  0x4b   :  { %v155_v36 = vsel %vm145_vm3, %v152_v26, %v154_v33  ;;  %v159_v42 = vsel %vm145_vm3, %v156_v29, %v158_v37  ;;  %v238_v53 = vshll.u32 %v672_v9, %v721_v6  ;;  %v167_v54 = vmul.u32 %v718_v4, %v151_v41 }
  0x4c   :  { %v731_v43 = vmul.u32.u64.low %v718_v4, %v155_v36  ;;  %v732_v45 = vmul.u32.u64.high %v718_v4, %v155_v36, %v731_v43  ;;  %v736_v46 = vmul.u32.u64.low %v718_v4, %v159_v42  ;;  %v737_v47 = vmul.u32.u64.high %v718_v4, %v159_v42, %v736_v46 }
  0x4d   :  { %v239_v57 = vshrl.u32 %v673_v12, %v230_v30  ;;  %v72_v58 = vand.u32 8388607, %v52_v35  ;;  %v231_v61 = vshrl.u32 %v670_v63, %v230_v30  ;;  %v241_v62 = vshll.u32 %v673_v12, %v721_v6 }
  0x4e   :  { %v170_v60 = vadd.s32 1, %v732_v45  ;;  %vm169_vm6 = vc.u32 %v737_v47, %v731_v43  ;;  %v234_v0 = vor.u32 %v233_v49, %v232_v48  ;;  %v237_v2 = vor.u32 %v236_v52, %v235_v51 }
  0x4f   :  { %v240_v1 = vor.u32 %v239_v57, %v238_v53  ;;  %v242_v7 = vshrl.u32 %v674_v15, %v230_v30  ;;  %v244_v4 = vshll.u32 %v674_v15, %v721_v6  ;;  %v245_v8 = vshrl.u32 %v675_v20, %v230_v30 }
  0x50   :  { %v171_v3 = vsel %vm169_vm6, %v170_v60, %v732_v45  ;;  %vm247_vm7 = vcmp.lt.s32.totalorder %v228_v56, 1  ;;  %vm248_vm8 = vcmp.lt.s32.totalorder %v228_v56, 2  ;;  %v263_v9 = vshll.u32 %v223_v55, 8 }
  0x51   :  { %v172_v59 = vadd.s32 %v171_v3, %v167_v54  ;;  %v243_v10 = vor.u32 %v242_v7, %v241_v62  ;;  %v246_v63 = vor.u32 %v245_v8, %v244_v4  ;;  %vm249_vm9 = vcmp.lt.s32.totalorder %v228_v56, 3 }
  0x52   :  { %vm250_vm10 = vcmp.lt.s32.totalorder %v228_v56, 4  ;;  %v255_v13 = vsel %vm247_vm7, %v234_v0, %v237_v2  ;;  %v259_v14 = vsel %vm247_vm7, %v237_v2, %v240_v1  ;;  %v53_v16 = vxor.u32 %v51_v50, %v49_v31 }
  0x53   :  { %v173_v11 = vadd.s32 536870912, %v172_v59  ;;  %v252_v12 = vsel %vm250_vm10, %v240_v1, 2102212464  ;;  %v251_v17 = vsel %vm247_vm7, %v231_v61, %v234_v0  ;;  %v256_v18 = vsel %vm250_vm10, %v243_v10, 920167782 }
  0x54   :  { %v260_v19 = vsel %vm250_vm10, %v246_v63, 1326507024  ;;  %v253_v6 = vsel %vm249_vm9, %v237_v2, %v252_v12  ;;  %v257_v15 = vsel %vm249_vm9, %v240_v1, %v256_v18  ;;  %v74_v24 = vor.u32 1065353216, %v72_v58 }
  0x55   :  { %v749_v21 = vshrl.u32 %v173_v11, 30  ;;  %v261_v20 = vsel %vm249_vm9, %v243_v10, %v260_v19  ;;  %v258_v22 = vsel %vm248_vm8, %v255_v13, %v257_v15  ;;  %v73_v28 = vand.u32 8388607, %v53_v16 }
  0x56   :  { %v262_v23 = vsel %vm248_vm8, %v259_v14, %v261_v20  ;;  %v254_v29 = vsel %vm248_vm8, %v251_v17, %v253_v6  ;;  %v758_v30 = vmul.u32.u64.low %v263_v9, %v258_v22  ;;  %v759_v31 = vmul.u32.u64.high %v263_v9, %v258_v22, %v758_v30 }
  0x57   :  { %v175_v25 = vshll.u32 %v749_v21, 30  ;;  %v754_v26 = vmul.u32.u64.low %v263_v9, %v262_v23  ;;  %v755_v27 = vmul.u32.u64.high %v263_v9, %v262_v23, %v754_v26  ;;  %v569_v33 = vadd.f32 -1.0, %v74_v24 }
  0x58   :  { %v270_v35 = vmul.u32 %v263_v9, %v254_v29  ;;  %v75_v36 = vor.u32 1065353216, %v73_v28  ;;  %v273_v37 = vadd.s32 1, %v759_v31  ;;  %v168_v51 = vadd.s32 %v731_v43, %v737_v47 }
  0x59   :  { %v176_v32 = vsub.s32 %v172_v59, %v175_v25  ;;  %vm272_vm11 = vc.u32 %v755_v27, %v758_v30  ;;  %v80_v42 = vsub.f32 1.0, %v569_v33  ;;  %v271_v12 = vadd.s32 %v758_v30, %v755_v27 }
  0x5a   :  { %v274_v41 = vsel %vm272_vm11, %v273_v37, %v759_v31  ;;  %v570_v48 = vadd.f32 -1.0, %v75_v36  ;;  %v198_v14 = vsub.s32 4, %v749_v21  ;;  %vm204_vm10 = vweird.f32 %v707_v38 }
  0x5b   :  { %v178_v34 = vsub.s32 0, %v176_v32  ;;  %v275_v46 = vadd.s32 %v274_v41, %v270_v35  ;;  %605 = vlog2.f32 %v80_v42 }
  0x5c   :  { %v81_v53 = vsub.f32 1.0, %v570_v48  ;;  %v199_v24 = vsel %vm114_vm13, %v198_v14, %v749_v21 }
  0x5d   :  { %v574_v40 = vmin.u32 %v178_v34, %v176_v32  ;;  %v276_v50 = vadd.s32 536870912, %v275_v46  ;;  %v201_v28 = vsel %vm769_vm14, 0, %v199_v24  ;;  %v531_v24 = vld [vmem:[#allocation4 + $0x8] sm:$0xff] }
  0x5e   :  { %607 = vlog2.f32 %v81_v53  ;;  %v413_v33 = vadd.s32 3, %v201_v28  ;;  %v205_v35 = vand.u32 3, %v201_v28 }
  0x5f   :  { %v180_v45 = vclz %v574_v40  ;;  %v277_v52 = vshrl.u32 %v276_v50, 30 }
  0x60   :  { %v414_v41 = vand.u32 3, %v413_v33  ;;  %vm207_vm2 = vcmp.eq.s32.totalorder %v205_v35, 0  ;;  %vm210_vm3 = vcmp.eq.s32.totalorder %v205_v35, 2  ;;  %vm206_vm7 = vcmp.lt.s32.totalorder %v205_v35, 2 }
  0x61   :  { %v575_v49 = vadd.s32 4294967294, %v180_v45  ;;  %v278_v58 = vshll.u32 %v277_v52, 30 }
  0x62   :  { %vm416_vm4 = vcmp.eq.s32.totalorder %v414_v41, 0  ;;  %vm419_vm5 = vcmp.eq.s32.totalorder %v414_v41, 2  ;;  %vm415_vm8 = vcmp.lt.s32.totalorder %v414_v41, 2 }
  0x63   :  { %vm576_vm12 = vcmp.lt.s32.totalorder %v575_v49, 0  ;;  %v279_v62 = vsub.s32 %v275_v46, %v278_v58 }
  0x64   :  { %v183_v54 = vsel %vm576_vm12, 0, %v575_v49 }
  0x65   :  { %v184_v55 = vsub.s32 32, %v183_v54  ;;  %v185_v56 = vshll.u32 %v176_v32, %v183_v54  ;;  %v188_v57 = vsub.s32 4294967266, %v183_v54  ;;  %v281_v1 = vsub.s32 0, %v279_v62  ;;  %v606_v8 = vpop.eup %605 }
  0x66   :  { %v91_v10 = vmul.f32 0.6931472, %v606_v8  ;;  %v301_v32 = vsub.s32 4, %v277_v52 }
  0x67   :  { %v186_v60 = vshrl.u32 %v168_v51, %v184_v55  ;;  %v189_v61 = vadd.s32 127, %v188_v57  ;;  %v578_v4 = vmin.u32 %v281_v1, %v279_v62 }
  0x68   :  { %v608_v13 = vpop.eup %607  ;;  %v94_v15 = vmul.f32 -2.0, %v91_v10  ;;  %v302_v37 = vsel %vm217_vm0, %v301_v32, %v277_v52 }
  0x69   :  { %v187_v0 = vor.u32 %v186_v60, %v185_v56  ;;  %v190_v2 = vshll.u32 %v189_v61, 23  ;;  %v283_v47 = vclz %v578_v4  ;;  %v93_v20 = vmul.f32 0.6931472, %v608_v13 }
  0x6a   :  { %v304_v48 = vsel %vm216_vm1, 0, %v302_v37  ;;  %vm98_vm6 = vcmp.eq.f32.partialorder %v94_v15, inf  ;;  %v101_v57 = vand.u32 2147483648, %v94_v15  ;;  %vm100_vm9 = vcmp.eq.f32.partialorder %v94_v15, 0.0 }
  0x6b   :  { %v191_v3 = vor.u32 4788187, %v190_v2  ;;  %v194_v7 = vcvt.s32.f32 %v187_v0  ;;  %v579_v9 = vadd.s32 4294967294, %v283_v47  ;;  %v783_v27 = vmul.f32 -2.0, %v93_v20 }
  0x6c   :  { %v517_v53 = vadd.s32 3, %v304_v48  ;;  %v308_v60 = vand.u32 3, %v304_v48 }
  0x6d   :  { %v192_v43 = vand.u32 2147483647, %v191_v3  ;;  %vm580_vm15 = vcmp.lt.s32.totalorder %v579_v9, 0  ;;  %vm105_vm11 = vcmp.eq.f32.partialorder %v783_v27, inf  ;;  %vm107_vm12 = vcmp.eq.f32.partialorder %v783_v27, 0.0 }
  0x6e   :  { %v286_v16 = vsel %vm580_vm15, 0, %v579_v9  ;;  %v518_v61 = vand.u32 3, %v517_v53  ;;  %v108_v3 = vand.u32 2147483648, %v783_v27  ;;  %vm310_vm15 = vcmp.eq.s32.totalorder %v308_v60, 0 }
  0x6f   :  { %v195_v59 = vmul.f32 %v194_v7, %v192_v43  ;;  %v287_v18 = vsub.s32 32, %v286_v16  ;;  %v288_v19 = vshll.u32 %v279_v62, %v286_v16  ;;  %v291_v6 = vsub.s32 4294967266, %v286_v16 }
  0x71   :  { %v196_v11 = vxor.u32 2147483648, %v195_v59  ;;  %v289_v22 = vshrl.u32 %v271_v12, %v287_v18  ;;  %v292_v23 = vadd.s32 127, %v291_v6 }
  0x73   :  { %v197_v17 = vsel %vm114_vm13, %v196_v11, %v195_v59  ;;  %v290_v25 = vor.u32 %v289_v22, %v288_v19  ;;  %v293_v26 = vshll.u32 %v292_v23, 23  ;;  %vm313_vm13 = vcmp.eq.s32.totalorder %v308_v60, 2  ;;  %v530_v23 = vld [vmem:[#allocation4] sm:$0xff] }
  0x74   :  { %v200_v44 = vsel %vm769_vm14, %v707_v38, %v197_v17  ;;  %vm523_vm14 = vcmp.eq.s32.totalorder %v518_v61, 2 }
  0x75   :  { %609 = vcosq.f32 %v200_v44  ;;  %v294_v29 = vor.u32 4788187, %v293_v26  ;;  %v297_v30 = vcvt.s32.f32 %v290_v25 }
  0x76   :  { %611 = vsinq.f32 %v200_v44 }
  0x77   :  { %613 = vrsqrt.f32 %v94_v15  ;;  %v295_v31 = vand.u32 2147483647, %v294_v29 }
  0x78   :  { %615 = vrsqrt.f32 %v783_v27 }
  0x79   :  { %v298_v34 = vmul.f32 %v297_v30, %v295_v31 }
  0x7b   :  { %v299_v36 = vxor.u32 2147483648, %v298_v34 }
  0x7d   :  { %v300_v42 = vsel %vm217_vm0, %v299_v36, %v298_v34  ;;  %vm520_vm0 = vcmp.eq.s32.totalorder %v518_v61, 0 }
  0x7e   :  { %v303_v46 = vsel %vm216_vm1, %v709_v39, %v300_v42  ;;  %vm307_vm1 = vweird.f32 %v709_v39 }
  0x7f   :  { %v610_v21 = vpop.eup %609  ;;  %617 = vcosq.f32 %v303_v46 }
  0x80   :  { %v612_v40 = vpop.eup %611  ;;  %v211_v50 = vxor.u32 2147483648, %v610_v21  ;;  %619 = vsinq.f32 %v303_v46 }
  0x81   :  { %v614_v45 = vpop.eup %613  ;;  %v208_v49 = vxor.u32 2147483648, %v612_v40 }
  0x82   :  { %v97_v51 = vmul.f32 %v614_v45, %v94_v15  ;;  %v616_v5 = vpop.eup %615  ;;  %v212_v54 = vsel %vm210_vm3, %v211_v50, %v612_v40  ;;  %v421_v56 = vsel %vm419_vm5, %v211_v50, %v612_v40  ;;  %vm519_vm3 = vcmp.lt.s32.totalorder %v518_v61, 2 }
  0x83   :  { %v209_v52 = vsel %vm207_vm2, %v610_v21, %v208_v49  ;;  %v418_v55 = vsel %vm416_vm4, %v610_v21, %v208_v49  ;;  %v104_v62 = vmul.f32 %v616_v5, %v783_v27  ;;  %vm309_vm2 = vcmp.lt.s32.totalorder %v308_v60, 2 }
  0x84   :  { %v99_v58 = vsel %vm98_vm6, %v94_v15, %v97_v51  ;;  %v213_v0 = vsel %vm206_vm7, %v209_v52, %v212_v54  ;;  %v422_v2 = vsel %vm415_vm8, %v418_v55, %v421_v56 }
  0x85   :  { %v102_v1 = vsel %vm100_vm9, %v101_v57, %v99_v58  ;;  %v214_v4 = vsel %vm204_vm10, nan, %v213_v0  ;;  %v423_v8 = vsel %vm204_vm10, nan, %v422_v2  ;;  %v106_v47 = vsel %vm105_vm11, %v783_v27, %v104_v62 }
  0x86   :  { %v318_v10 = vmul.f32 %v214_v4, %v102_v1  ;;  %v528_v11 = vmul.f32 %v423_v8, %v102_v1  ;;  %v109_v12 = vsel %vm107_vm12, %v108_v3, %v106_v47 }
  0x88   :  { %v532_v44 = vmul.f32 0.05, %v318_v10  ;;  %v534_v39 = vmul.f32 0.05, %v528_v11 }
  0x89   :  { %v618_v7 = vpop.eup %617 }
  0x8a   :  { %v620_v43 = vpop.eup %619  ;;  %v314_v59 = vxor.u32 2147483648, %v618_v7 }
  0x8b   :  { %v311_v38 = vxor.u32 2147483648, %v620_v43 }
  0x8c   :  { %v315_v9 = vsel %vm313_vm13, %v314_v59, %v620_v43  ;;  %v525_v63 = vsel %vm523_vm14, %v314_v59, %v620_v43 }
  0x8d   :  { %v312_v13 = vsel %vm310_vm15, %v618_v7, %v311_v38  ;;  %v522_v14 = vsel %vm520_vm0, %v618_v7, %v311_v38 }
  0x8e   :  { %v316_v16 = vsel %vm309_vm2, %v312_v13, %v315_v9  ;;  %v526_v17 = vsel %vm519_vm3, %v522_v14, %v525_v63 }
  0x8f   :  { %v317_v18 = vsel %vm307_vm1, nan, %v316_v16  ;;  %v527_v19 = vsel %vm307_vm1, nan, %v526_v17 }
  0x90   :  { %v319_v6 = vmul.f32 %v317_v18, %v109_v12  ;;  %v529_v15 = vmul.f32 %v527_v19, %v109_v12 }
  0x92   :  { %v533_v20 = vmul.f32 0.05, %v319_v6  ;;  %v535_v22 = vmul.f32 0.05, %v529_v15 }
  0x94   :  { %v540_v25 = vcombine.low %v532_v44, %v533_v20  ;;  %v541_v26 = vcombine.low %v534_v39, %v535_v22 }
  0x96   :  { %v544_v28 = vadd.f32 %v540_v25, %v530_v23  ;;  %v545_v29 = vadd.f32 %v541_v26, %v531_v24 }
  0x98   :  { %v546_v27 = vadd.f32 0.1, %v544_v28  ;;  %v547_v30 = vadd.f32 0.1, %v545_v29 }
  0x9a   :  { %v548_v31 = vmin.f32 %v546_v27, 1.0  ;;  %v549_v32 = vmin.f32 %v547_v30, 1.0 }
  0x9c   :  { %v550_v33 = vmax.f32 %v548_v31, 0.0  ;;  %v551_v34 = vmax.f32 %v549_v32, 0.0 }
  0x9e   :  { %552 = vst [vmem:[#allocation7] sm:$0xff] %v550_v33  ;;  %553 = vst [vmem:[#allocation7 + $0x8] sm:$0xff] %v551_v34 }
  0x9f   :  { %654 = shalt.err (!%p651_p12)
}
  0xa0   :  { %s655_s26 = scalar_lea.hbm %s815_s2, 256 }
  0xa1   :  { %p656_p13 = scmp.ne.s32.totalorder %s815_s2, %s655_s26  ;;  %p659_p0 = scmp.lt.u32.totalorder %s655_s26, %s815_s2 }
  0xa3   :  { %p661_p1 = pnand %p659_p0, %p656_p13 }
  0xa5   :  { %664 = shalt.err (!%p661_p1)
}
  0xa6   :  { %563 = dma.vmem_to_hbm [thread:$0]  %s561_s1, 256, %s815_s2, [#allocation6]  }
  0xa7   :  { %667 = dma.done.wait [#allocation6], 256  }
  0xa8   :  { %668 = vsyncadd [#allocation6], 4294967040 }
  0xa9   :  { %567 = vsyncpa [#allocation5], 1 }
  0xaa   :  { %568 = vsyncpa [#allocation6], 1 }

</bundles_post_ra>
